<compile_context>
chip_gen: v7x
topology: tpu7x:2x2x1
jax: 0.10.0
libtpu: 0.0.40
codegen_flags: <defaults>
</compile_context>

<pallas_src>
import functools

import jax
import jax.numpy as jnp
from jax.experimental import pallas as pl
from jax.experimental.pallas import tpu as pltpu

BN_EPS = 1e-5


def _round_up(n, m):
    return ((n + m - 1) // m) * m


def mlp_kernel(x_ref, w1_ref, b1_ref, w2_ref, b2_ref, w3_ref, b3_ref, o_ref):
    x = x_ref[...]                                                    # (TILE_B, in_dim)

    h = jnp.dot(x, w1_ref[...], preferred_element_type=jnp.float32) + b1_ref[...]
    h = jnp.maximum(h, 0.0)                                           # layer1 + ReLU (BN1 folded into W2/b2)

    h = jnp.dot(h, w2_ref[...], preferred_element_type=jnp.float32) + b2_ref[...]
    h = jnp.maximum(h, 0.0)                                           # hidden + ReLU (BN2 folded into W3/b3)

    # dropout(p=0.25) is identity in eval mode
    logits = jnp.dot(h, w3_ref[...], preferred_element_type=jnp.float32) + b3_ref[...]
    o_ref[...] = jax.nn.sigmoid(logits)                               # (TILE_B, out_dim) store (masked vst)


def fold_bn_params(params):
    """Eval-mode BN folding, done ONCE at parameter-load time.

    BN(relu(x @ W + b)) @ Wn = relu(x @ W + b) @ (diag(s) @ Wn) + (t @ Wn)
      with s = g * rsqrt(v + eps), t = beta - m * s.
    Returns (w1, b1, w2f, b2f, w3f, b3f).
    """
    s1 = params["g1"] * jax.lax.rsqrt(params["v1"] + BN_EPS)          # (1, H)
    t1 = params["bt1"] - params["m1"] * s1                            # (1, H)
    s2 = params["g2"] * jax.lax.rsqrt(params["v2"] + BN_EPS)
    t2 = params["bt2"] - params["m2"] * s2

    w2f = s1.T * params["w2"]                                         # diag(s1) @ W2
    b2f = t1 @ params["w2"] + params["b2"]
    w3f = s2.T * params["w3"]                                         # diag(s2) @ W3
    b3f = t2 @ params["w3"] + params["b3"]
    return (params["w1"], params["b1"], w2f, b2f, w3f, b3f)


@functools.partial(jax.jit, static_argnames=("tile_b",))
def mlp_forward(x, folded, *, tile_b=8192):
    """x: (B, input_dim) float32; folded: output of fold_bn_params."""
    w1, b1, w2f, b2f, w3f, b3f = folded
    B, in_dim = x.shape
    H = w1.shape[1]
    out_dim = w3f.shape[1]

    # Batch tile: multiple of 8 (sublane), adaptive to B, no host-side padding.
    tile_b = min(tile_b, _round_up(B, 8))
    grid = (pl.cdiv(B, tile_b),)   # ragged last block handled by Pallas (OOB writes dropped)

    resident = lambda i: (0, 0)    # params loaded once, stay VMEM-resident across batch tiles
    return pl.pallas_call(
        mlp_kernel,
        out_shape=jax.ShapeDtypeStruct((B, out_dim), jnp.float32),    # true width, no padding
        grid=grid,
        in_specs=[
            pl.BlockSpec((tile_b, in_dim), lambda i: (i, 0)),         # x: streamed per batch tile
            pl.BlockSpec((in_dim, H), resident),                      # w1
            pl.BlockSpec((1, H), resident),                           # b1
            pl.BlockSpec((H, H), resident),                           # w2 (BN1 folded)
            pl.BlockSpec((1, H), resident),                           # b2 (BN1 folded)
            pl.BlockSpec((H, out_dim), resident),                     # w3 (BN2 folded)
            pl.BlockSpec((1, out_dim), resident),                     # b3 (BN2 folded)
        ],
        out_specs=pl.BlockSpec((tile_b, out_dim), lambda i: (i, 0)),
        compiler_params=pltpu.CompilerParams(
            dimension_semantics=("parallel",),       # shard batch tiles across TCs (v7x megacore)
            vmem_limit_bytes=48 * 1024 * 1024,       # headroom for tile_b=8192 lane-padded buffers
        ),
    )(x, w1, b1, w2f, b2f, w3f, b3f)


def init_params(key, input_dim, output_dim, hidden=20):
    """Deterministic synthetic parameters matching nn.Linear/nn.BatchNorm1d shapes.
    Linear weights are stored transposed: (in_features, out_features)."""
    ks = jax.random.split(key, 12)

    def lin(kw, kb, fan_in, fan_out):
        bound = 1.0 / jnp.sqrt(fan_in)
        w = jax.random.uniform(kw, (fan_in, fan_out), jnp.float32, -bound, bound)
        b = jax.random.uniform(kb, (1, fan_out), jnp.float32, -bound, bound)
        return w, b

    w1, b1 = lin(ks[0], ks[1], input_dim, hidden)
    w2, b2 = lin(ks[2], ks[3], hidden, hidden)
    w3, b3 = lin(ks[4], ks[5], hidden, output_dim)

    def bn(kg, kb, km, kv, dim):
        g = 1.0 + 0.1 * jax.random.normal(kg, (1, dim), jnp.float32)
        bt = 0.1 * jax.random.normal(kb, (1, dim), jnp.float32)
        m = 0.1 * jax.random.normal(km, (1, dim), jnp.float32)
        v = 0.5 + jnp.abs(jax.random.normal(kv, (1, dim), jnp.float32))
        return g, bt, m, v

    g1, bt1, m1, v1 = bn(ks[6], ks[7], ks[8], ks[9], hidden)
    g2, bt2, m2, v2 = bn(ks[10], ks[11], ks[6], ks[7], hidden)

    return dict(w1=w1, b1=b1, g1=g1, bt1=bt1, m1=m1, v1=v1,
                w2=w2, b2=b2, g2=g2, bt2=bt2, m2=m2, v2=v2,
                w3=w3, b3=b3)


def mlp_reference(x, p):
    """Plain-JAX reference of the original (un-folded) eval-mode forward."""
    h = jnp.maximum(x @ p["w1"] + p["b1"], 0.0)
    h = (h - p["m1"]) / jnp.sqrt(p["v1"] + BN_EPS) * p["g1"] + p["bt1"]
    h = jnp.maximum(h @ p["w2"] + p["b2"], 0.0)
    h = (h - p["m2"]) / jnp.sqrt(p["v2"] + BN_EPS) * p["g2"] + p["bt2"]
    return jax.nn.sigmoid(h @ p["w3"] + p["b3"])


if __name__ == "__main__":
    key = jax.random.PRNGKey(0)
    kx, kp = jax.random.split(key)

    B, input_dim, output_dim = 8, 16, 4
    x = jax.random.normal(kx, (B, input_dim), jnp.float32)
    params = init_params(kp, input_dim, output_dim)

    folded = fold_bn_params(params)   # one-time host-side BN folding
    out = mlp_forward(x, folded)
    out = jax.block_until_ready(out)

    ref = mlp_reference(x, params)
    assert out.shape == (B, output_dim)
    assert jnp.allclose(out, ref, atol=2e-5, rtol=1e-4), "mismatch vs reference"

    print("KERNEL_OK")
</pallas_src>

<mosaic_0001>
module attributes {stable_mosaic.version = 11 : i64} {
  func.func @mlp_kernel(%arg0: i32, %arg1: memref<8x16xf32, #tpu.memory_space<vmem>>, %arg2: memref<16x20xf32, #tpu.memory_space<vmem>>, %arg3: memref<1x20xf32, #tpu.memory_space<vmem>>, %arg4: memref<20x20xf32, #tpu.memory_space<vmem>>, %arg5: memref<1x20xf32, #tpu.memory_space<vmem>>, %arg6: memref<20x4xf32, #tpu.memory_space<vmem>>, %arg7: memref<1x4xf32, #tpu.memory_space<vmem>>, %arg8: memref<8x4xf32, #tpu.memory_space<vmem>>) attributes {dimension_semantics = [#tpu.dimension_semantics<parallel>], iteration_bounds = array<i64: 1>, scalar_prefetch = 0 : i64, scratch_operands = 0 : i64, tpu.core_type = #tpu.core_type<tc>, window_params = [{transform_indices = @transform_0, window_bounds = array<i64: 8, 16>}, {pipeline_mode = #tpu.pipeline_mode<synchronous>, transform_indices = @transform_1, window_bounds = array<i64: 16, 20>}, {pipeline_mode = #tpu.pipeline_mode<synchronous>, transform_indices = @transform_2, window_bounds = array<i64: 1, 20>}, {pipeline_mode = #tpu.pipeline_mode<synchronous>, transform_indices = @transform_3, window_bounds = array<i64: 20, 20>}, {pipeline_mode = #tpu.pipeline_mode<synchronous>, transform_indices = @transform_4, window_bounds = array<i64: 1, 20>}, {pipeline_mode = #tpu.pipeline_mode<synchronous>, transform_indices = @transform_5, window_bounds = array<i64: 20, 4>}, {pipeline_mode = #tpu.pipeline_mode<synchronous>, transform_indices = @transform_6, window_bounds = array<i64: 1, 4>}, {transform_indices = @transform_7, window_bounds = array<i64: 8, 4>}]} {
    %c0 = arith.constant 0 : index
    %c0_0 = arith.constant 0 : index
    %0 = vector.load %arg1[%c0, %c0_0] : memref<8x16xf32, #tpu.memory_space<vmem>>, vector<8x16xf32>
    %c0_1 = arith.constant 0 : index
    %c0_2 = arith.constant 0 : index
    %1 = vector.load %arg2[%c0_1, %c0_2] : memref<16x20xf32, #tpu.memory_space<vmem>>, vector<16x20xf32>
    %cst = arith.constant dense<0.000000e+00> : vector<8x20xf32>
    %2 = tpu.matmul %0, %1, %cst {dimension_numbers = #tpu.dot_dimension_numbers<[1], [0], [0], [1], [0, 0, 1, 1], [], []>} : vector<8x16xf32>, vector<16x20xf32>, vector<8x20xf32> -> vector<8x20xf32>
    %c0_3 = arith.constant 0 : index
    %c0_4 = arith.constant 0 : index
    %3 = vector.load %arg3[%c0_3, %c0_4] : memref<1x20xf32, #tpu.memory_space<vmem>>, vector<1x20xf32>
    %4 = vector.broadcast %3 : vector<1x20xf32> to vector<8x20xf32>
    %5 = arith.addf %2, %4 : vector<8x20xf32>
    %cst_5 = arith.constant 0.000000e+00 : f32
    %6 = vector.broadcast %cst_5 : f32 to vector<8x20xf32>
    %7 = arith.maximumf %5, %6 : vector<8x20xf32>
    %c0_6 = arith.constant 0 : index
    %c0_7 = arith.constant 0 : index
    %8 = vector.load %arg4[%c0_6, %c0_7] : memref<20x20xf32, #tpu.memory_space<vmem>>, vector<20x20xf32>
    %cst_8 = arith.constant dense<0.000000e+00> : vector<8x20xf32>
    %9 = tpu.matmul %7, %8, %cst_8 {dimension_numbers = #tpu.dot_dimension_numbers<[1], [0], [0], [1], [0, 0, 1, 1], [], []>} : vector<8x20xf32>, vector<20x20xf32>, vector<8x20xf32> -> vector<8x20xf32>
    %c0_9 = arith.constant 0 : index
    %c0_10 = arith.constant 0 : index
    %10 = vector.load %arg5[%c0_9, %c0_10] : memref<1x20xf32, #tpu.memory_space<vmem>>, vector<1x20xf32>
    %11 = vector.broadcast %10 : vector<1x20xf32> to vector<8x20xf32>
    %12 = arith.addf %9, %11 : vector<8x20xf32>
    %cst_11 = arith.constant 0.000000e+00 : f32
    %13 = vector.broadcast %cst_11 : f32 to vector<8x20xf32>
    %14 = arith.maximumf %12, %13 : vector<8x20xf32>
    %c0_12 = arith.constant 0 : index
    %c0_13 = arith.constant 0 : index
    %15 = vector.load %arg6[%c0_12, %c0_13] : memref<20x4xf32, #tpu.memory_space<vmem>>, vector<20x4xf32>
    %cst_14 = arith.constant dense<0.000000e+00> : vector<8x4xf32>
    %16 = tpu.matmul %14, %15, %cst_14 {dimension_numbers = #tpu.dot_dimension_numbers<[1], [0], [0], [1], [0, 0, 1, 1], [], []>} : vector<8x20xf32>, vector<20x4xf32>, vector<8x4xf32> -> vector<8x4xf32>
    %c0_15 = arith.constant 0 : index
    %c0_16 = arith.constant 0 : index
    %17 = vector.load %arg7[%c0_15, %c0_16] : memref<1x4xf32, #tpu.memory_space<vmem>>, vector<1x4xf32>
    %18 = vector.broadcast %17 : vector<1x4xf32> to vector<8x4xf32>
    %19 = arith.addf %16, %18 : vector<8x4xf32>
    %20 = arith.negf %19 : vector<8x4xf32>
    %21 = math.exp %20 : vector<8x4xf32>
    %cst_17 = arith.constant 1.000000e+00 : f32
    %22 = vector.broadcast %cst_17 : f32 to vector<8x4xf32>
    %23 = arith.addf %22, %21 : vector<8x4xf32>
    %24 = arith.divf %22, %23 : vector<8x4xf32>
    %c0_18 = arith.constant 0 : index
    %c0_19 = arith.constant 0 : index
    %25 = vector.load %arg8[%c0_18, %c0_19] : memref<8x4xf32, #tpu.memory_space<vmem>>, vector<8x4xf32>
    tpu.vector_store %arg8[%c0_18, %c0_19], %24 {strides = array<i32>} : memref<8x4xf32, #tpu.memory_space<vmem>>, vector<8x4xf32>,
    return
  }
  func.func @transform_0(%arg0: i32) -> (i32, i32) {
    %c0_i32 = arith.constant 0 : i32
    %c0_i32_0 = arith.constant 0 : i32
    return %arg0, %c0_i32 : i32, i32
  }
  func.func @transform_1(%arg0: i32) -> (i32, i32) {
    %c0_i32 = arith.constant 0 : i32
    %c0_i32_0 = arith.constant 0 : i32
    %c0_i32_1 = arith.constant 0 : i32
    return %c0_i32, %c0_i32_0 : i32, i32
  }
  func.func @transform_2(%arg0: i32) -> (i32, i32) {
    %c0_i32 = arith.constant 0 : i32
    %c0_i32_0 = arith.constant 0 : i32
    %c0_i32_1 = arith.constant 0 : i32
    return %c0_i32, %c0_i32_0 : i32, i32
  }
  func.func @transform_3(%arg0: i32) -> (i32, i32) {
    %c0_i32 = arith.constant 0 : i32
    %c0_i32_0 = arith.constant 0 : i32
    %c0_i32_1 = arith.constant 0 : i32
    return %c0_i32, %c0_i32_0 : i32, i32
  }
  func.func @transform_4(%arg0: i32) -> (i32, i32) {
    %c0_i32 = arith.constant 0 : i32
    %c0_i32_0 = arith.constant 0 : i32
    %c0_i32_1 = arith.constant 0 : i32
    return %c0_i32, %c0_i32_0 : i32, i32
  }
  func.func @transform_5(%arg0: i32) -> (i32, i32) {
    %c0_i32 = arith.constant 0 : i32
    %c0_i32_0 = arith.constant 0 : i32
    %c0_i32_1 = arith.constant 0 : i32
    return %c0_i32, %c0_i32_0 : i32, i32
  }
  func.func @transform_6(%arg0: i32) -> (i32, i32) {
    %c0_i32 = arith.constant 0 : i32
    %c0_i32_0 = arith.constant 0 : i32
    %c0_i32_1 = arith.constant 0 : i32
    return %c0_i32, %c0_i32_0 : i32, i32
  }
  func.func @transform_7(%arg0: i32) -> (i32, i32) {
    %c0_i32 = arith.constant 0 : i32
    %c0_i32_0 = arith.constant 0 : i32
    return %arg0, %c0_i32 : i32, i32
  }
}

</mosaic_0001>

<bundles_post_ra>
// kernel: mlp_forward.1
= control target key start
LH: loop header
LB: loop body
LE: loop exit
PB: predicated region body
PF: predicated region fallthrough
CT: control target
= control target key end

     0   :  { %12 = vsyncpa [#allocation3], 0  ;;  %s401_s24 = smov [#allocation2]   ;;  %s492_s0 = inlined_call_operand.vmem [shape: f32[8,16], index: 0, kind: input, shape index: {}]   ;;  %s493_s1 = inlined_call_operand.hbm [shape: f32[16,20], index: 1, kind: input, shape index: {}]   ;;  %s494_s2 = inlined_call_operand.vmem [shape: f32[1,20], index: 2, kind: input, shape index: {}]   ;;  %s495_s3 = inlined_call_operand.vmem [shape: f32[20,20], index: 3, kind: input, shape index: {}]   ;;  %s496_s4 = inlined_call_operand.vmem [shape: f32[1,20], index: 4, kind: input, shape index: {}]   ;;  %s497_s5 = inlined_call_operand.vmem [shape: f32[20,4], index: 5, kind: input, shape index: {}]   ;;  %s498_s6 = inlined_call_operand.vmem [shape: f32[1,4], index: 6, kind: input, shape index: {}]   ;;  %s499_s7 = inlined_call_operand.vmem [shape: f32[8,4], index: 7, kind: output, shape index: {}]  }
   0x1   :  { %s20_s25 = sshll.u32 %s401_s24, 4  ;;  %s377_s28 = scalar_lea.hbm %s493_s1, 256  ;;  %s21_s25 = int_to_ptr.vmem [resolvable:$true] %s20_s25 }
   0x2   :  { %p378_p0 = scmp.ne.s32.totalorder %s493_s1, %s377_s28  ;;  %p381_p1 = scmp.lt.u32.totalorder %s377_s28, %s493_s1 }
   0x4   :  { %p383_p2 = pnand %p381_p1, %p378_p0 }
   0x6   :  { %386 = shalt.err (!%p383_p2)
}
   0x7   :  { %s387_s10 = scalar_lea.vmem %s21_s25, 256  ;;  %p392_p4 = scmp.lt.s32.totalorder %s21_s25, %s21_s25 }
   0x8   :  { %p388_p3 = scmp.ne.s32.totalorder %s21_s25, %s387_s10  ;;  %p393_p5 = scmp.lt.s32.totalorder %s387_s10, %s387_s10 }
   0xa   :  { %p394_p6 = por %p393_p5, %p392_p4 }
   0xc   :  { %p395_p7 = pnand %p394_p6, %p388_p3 }
   0xe   :  { %398 = shalt.err (!%p395_p7)
}
   0xf   :  { %s402_s11 = smov 128   ;;  %s403_s12 = smov 8  }
  0x10   :  { %26 = dma.hbm_to_vmem [thread:$0]  %s493_s1, 256, %s21_s25, [#allocation3], %s402_s11, %s402_s11, %s403_s12  }
  0x11   :  { %399 = dma.done.wait [#allocation3], 256  }
  0x12   :  { %400 = vsyncadd [#allocation3], 4294967040  ;;  %v404_v0 = vmov 0.0|0.0   ;;  %vm405_vm0 = vmmov 0   ;;  %v406_v1 = vmov 0.0   ;;  %v41_v2 = vld [vmem:[#allocation2] sm:$0xff] }
  0x13   :  { %358 = vmatprep.subr.bf16.mxu0 %v404_v0  ;;  %337 = vmatprep.mubr.msk.f32.mxu0 %vm405_vm0, %v406_v1  ;;  %v42_v3 = vld [vmem:[#allocation2 + $0x8] sm:$0xff]  ;;  %v40_v5 = vld [vmem:[%s492_s0] sm:$0xff]  ;;  %vm50_vm1 = vcmask 130048   ;;  %v127_v9 = vld [vmem:[%s495_s3 + $0x10] sm:$0xf]  ;;  %vm139_vm2 = vcmask 1043456  }
  0x14   :  { %361 = vmatprep.subr.bf16.mxu1 %v404_v0  ;;  %346 = vmatprep.mubr.msk.f32.mxu1 %vm405_vm0, %v406_v1  ;;  %v359_v4 = vpack.c.bf16 %v42_v3, %v41_v2  ;;  %v125_v6 = vld [vmem:[%s495_s3] sm:$0xff]  ;;  %v126_v7 = vld [vmem:[%s495_s3 + $0x8] sm:$0xff]  ;;  %vm135_vm3 = vcmask 162816   ;;  %v216_v18 = vld [vmem:[%s497_s5 + $0x10] sm:$0xf]  ;;  %vm306_vm4 = vcmask 31744  }
  0x15   :  { %v362_v8 = vpack.c.bf16 %v126_v7, %v125_v6  ;;  %v214_v10 = vld [vmem:[%s497_s5] sm:$0xff]  ;;  %v215_v11 = vld [vmem:[%s497_s5 + $0x8] sm:$0xff] }
  0x16   :  { %360 = vmatpush3.bf16.msra.mxu0 %v359_v4  ;;  %v365_v12 = vpack.c.bf16 %v215_v11, %v214_v10  ;;  %v313_v13 = vld [vmem:[%s494_s2] ss:$0 sm:$0xff] }
  0x17   :  { %364 = vmatprep.subr.bf16.mxu0 %v404_v0  ;;  %363 = vmatpush3.bf16.msra.mxu1 %v362_v8  ;;  %v315_v19 = vld [vmem:[%s496_s4] ss:$0 sm:$0xff] }
  0x18   :  { %344 = vmatprep.subr.mxu1 %v406_v1  ;;  %v318_v24 = vld [vmem:[%s498_s6] ss:$0 sm:$0xff] }
  0x19   :  { %338 = vmatmul.mubr.msk.f32.vlgmr.msra.gmra.mrb[0].mxu0 %vm50_vm1, %v40_v5 }
  0x1a   :  { %355 = vmatprep.mubr.msk.f32.mxu0 %vm405_vm0, %v406_v1  ;;  %366 = vmatpush3.bf16.msra.mxu0 %v365_v12 }
  0x1b   :  { %345 = vmatpush3.msk.msra.mxu1 %vm139_vm2, %v127_v9  ;;  %353 = vmatprep.subr.mxu0 %v406_v1 }
  0x1e   :  { %354 = vmatpush3.msk.msra.mxu0 %vm139_vm2, %v216_v18 }
  0xec   :  { %v120_v14 = vpop.f32.mrb[0].mxu0 }
  0xed   :  { %v121_v15 = vadd.f32 %v313_v13, %v120_v14  ;;  %v339_v16 = vpop.f32.mrb[1].mxu0 }
  0xef   :  { %v124_v17 = vmax.f32 %v121_v15, 0.0 }
  0xf1   :  { %347 = vmatmul.mubr.msk.f32.vlgmr.msra.gmra.mrb[0].mxu1 %vm135_vm3, %v124_v17 }
 0x1c4   :  { %v209_v20 = vpop.f32.mrb[0].mxu1 }
 0x1c5   :  { %v210_v21 = vadd.f32 %v315_v19, %v209_v20  ;;  %v348_v22 = vpop.f32.mrb[1].mxu1 }
 0x1c7   :  { %v213_v23 = vmax.f32 %v210_v21, 0.0 }
 0x1c9   :  { %356 = vmatmul.mubr.msk.f32.vlgmr.msra.gmra.mrb[2].mxu0 %vm135_vm3, %v213_v23 }
 0x29c   :  { %v296_v25 = vpop.f32.mrb[2].mxu0 }
 0x29d   :  { %v297_v26 = vadd.f32 %v318_v24, %v296_v25  ;;  %v357_v27 = vpop.f32.mrb[3].mxu0 }
 0x29f   :  { %v321_v28 = vmul.f32 -1.442695, %v297_v26 }
 0x2a1   :  { %373 = vpow2.f32 %v321_v28 }
 0x2ab   :  { %v374_v29 = vpop.eup %373 }
 0x2ac   :  { %v303_v30 = vadd.f32 1.0, %v374_v29 }
 0x2ae   :  { %375 = vrcp.f32 %v303_v30 }
 0x2b8   :  { %v376_v31 = vpop.eup %375 }
 0x2b9   :  { %307 = vst.msk [vmem:[%s499_s7] sm:$0xff] %vm306_vm4, %v376_v31 }
 0x2ba   :  { %312 = vsyncpa [#allocation3], 1 }

</bundles_post_ra>
